<compile_context>
chip_gen: v6e
topology: v6e:2x2x1
jax: 0.10.0
libtpu: 0.0.40
codegen_flags: <defaults>
</compile_context>

<pallas_src>
import functools

import jax
import jax.numpy as jnp
from jax.experimental import pallas as pl
from jax.experimental.pallas import tpu as pltpu


def _cdiv(a, b):
    return -(-a // b)


def _round_up(x, m):
    return _cdiv(x, m) * m


def _lora_kernel(h_ref, a_ref, bs_ref, o_ref, *, matmul_dtype):
    h = h_ref[...]                                           # [tm, H]
    # First rank-r matmul: h @ A with A in natural [H, r] (K, N) orientation,
    # so no hidden RHS transpose / per-step XLU copy is generated.
    t = jnp.dot(h.astype(matmul_dtype), a_ref[...],
                preferred_element_type=jnp.float32)          # [tm, r], f32 accum
    # Second matmul against (alpha * B); alpha pre-folded outside the kernel.
    lora = jnp.dot(t.astype(bs_ref.dtype), bs_ref[...],
                   preferred_element_type=jnp.float32)       # [tm, H], f32 accum
    # Residual add in the output dtype; no extra [tm, H] f32 copy of h.
    o_ref[...] = h + lora.astype(o_ref.dtype)


def _vmem_capacity_bytes():
    try:
        info = pltpu.get_tpu_info()
        cap = getattr(info, "vmem_capacity_bytes", None)
        if cap:
            return int(cap)
    except Exception:
        pass
    return 64 * 1024 * 1024            # conservative: v7x per-TensorCore VMEM


def _pick_tm(M, H, itemsize, budget_bytes):
    # Live VMEM per grid step ~ 2x double-buffered input + 2x output [tm, H]
    # blocks (itemsize each) + the f32 lora intermediate + a downcast temp.
    per_row = (5 * itemsize + 4) * H
    cap = max(8, budget_bytes // per_row)
    target = min(512, cap)             # >=512 rows already ~85% of HBM roofline
    if M > 8:
        # Keep at least 2 row tiles so ("parallel",) can feed both v7x TCs.
        target = min(target, _round_up(_cdiv(M, 2), 8))
    target = max(8, (target // 8) * 8)
    # Balance tiles so the ragged last block wastes as few rows as possible.
    n_tiles = _cdiv(M, target)
    tm = _round_up(_cdiv(M, n_tiles), 8)
    return min(tm, _round_up(M, 8))


def lora_forward(hidden, lora_A, lora_B, *, alpha, tm=None, matmul_dtype=None):
    """hidden: [batch, seq, H] -> hidden + alpha * (hidden @ lora_A @ lora_B)."""
    batch, seq, H = hidden.shape
    r = lora_A.shape[1]
    M = batch * seq
    itemsize = jnp.dtype(hidden.dtype).itemsize

    # On v5e (no bf16 VPU, bf16-native MXU) an f32 input should set
    # matmul_dtype=jnp.bfloat16 to stay HBM-bound; the default keeps the
    # hidden dtype so f32 inputs match the PyTorch f32 reference.
    if matmul_dtype is None:
        matmul_dtype = hidden.dtype

    vmem_cap = _vmem_capacity_bytes()
    budget = (3 * vmem_cap) // 4       # leave headroom for internal scratch
    if tm is None:
        tm = _pick_tm(M, H, itemsize, budget)
    tm = max(8, min((tm // 8) * 8, _round_up(M, 8)))

    # No host-side padding: the ragged last block (M % tm != 0) is handled by
    # Pallas's masked partial-block load/store on the last grid step.
    h2d = hidden.reshape(M, H)

    # Kernel-resident weights: A in natural [H, r]; alpha folded into B.
    a_nat = lora_A.astype(matmul_dtype)                               # [H, r]
    b_scaled = (jnp.float32(alpha)
                * lora_B.astype(jnp.float32)).astype(matmul_dtype)    # [r, H]

    # VMEM accounting including the in-kernel f32 intermediates.
    w_item = jnp.dtype(matmul_dtype).itemsize
    block_bytes = tm * H * itemsize
    w_bytes = (_round_up(H, 8) * _round_up(r, 128)
               + _round_up(r, 8) * _round_up(H, 128)) * w_item
    est = (4 * block_bytes            # 2x in + 2x out double-buffered blocks
           + tm * H * 4               # f32 lora intermediate
           + block_bytes              # downcast / add temp
           + 2 * w_bytes
           + 2 * 1024 * 1024)         # headroom
    vmem_limit = int(min(budget, max(16 * 1024 * 1024, est)))

    kernel = functools.partial(_lora_kernel, matmul_dtype=matmul_dtype)

    out2d = pl.pallas_call(
        kernel,
        out_shape=jax.ShapeDtypeStruct((M, H), hidden.dtype),
        grid_spec=pltpu.PrefetchScalarGridSpec(
            num_scalar_prefetch=0,
            grid=(_cdiv(M, tm),),
            in_specs=[
                pl.BlockSpec((tm, H), lambda i: (i, 0)),   # hidden row tile
                pl.BlockSpec((H, r), lambda i: (0, 0)),    # A, resident [H, r]
                pl.BlockSpec((r, H), lambda i: (0, 0)),    # alpha*B, resident
            ],
            out_specs=pl.BlockSpec((tm, H), lambda i: (i, 0)),
        ),
        compiler_params=pltpu.CompilerParams(
            dimension_semantics=("parallel",),   # shard row tiles across TCs (v7x)
            vmem_limit_bytes=vmem_limit),
        # NOTE: no input_output_aliases -- hidden stays live in the caller, so
        # aliasing would force XLA to insert a defensive full-tensor copy.
    )(h2d, a_nat, b_scaled)

    return out2d.reshape(batch, seq, H)


def base_model_stub(input_ids, embedding, attention_mask=None):
    """Deterministic stand-in for the frozen pretrained model.

    Returns (hidden_states [B,S,H], second_output) mimicking
    `original_output[0]`, `original_output[1]`.
    """
    # TODO(synk): the real frozen transformer (BLOOM) has no single-kernel
    # Pallas equivalent; stubbed with an embedding lookup in plain JAX.
    h = embedding[input_ids]                                   # [B, S, H]
    if attention_mask is not None:
        h = h * attention_mask[..., None].astype(h.dtype)
    pooled = h.mean(axis=1)                                    # [B, H] synthetic 2nd output
    return (h, pooled)


if __name__ == "__main__":
    r = 8
    alpha = 16.0
    batch, seq, hidden_size, vocab = 2, 8, 128, 100

    key = jax.random.PRNGKey(0)
    k_emb, k_a, k_b, k_ids, k_ids2 = jax.random.split(key, 5)

    embedding = jax.random.normal(k_emb, (vocab, hidden_size), dtype=jnp.float32)
    lora_A = jax.random.normal(k_a, (hidden_size, r), dtype=jnp.float32)  # torch.randn(hidden, r)
    lora_B = jax.random.normal(k_b, (r, hidden_size), dtype=jnp.float32)  # torch.randn(r, hidden)

    input_ids = jax.random.randint(k_ids, (batch, seq), 0, vocab)
    attention_mask = jnp.ones((batch, seq), dtype=jnp.int32)

    # Forward: frozen base model -> LoRA adapter (Pallas) -> combined output.
    original_output = base_model_stub(input_ids, embedding, attention_mask)
    combined = lora_forward(original_output[0], lora_A, lora_B, alpha=alpha)
    out = (combined, original_output[1])

    jax.block_until_ready(out[0])
    jax.block_until_ready(out[1])

    # Reference check in plain JAX.
    h = original_output[0]
    ref = h + alpha * (h @ lora_A @ lora_B)
    assert jnp.allclose(out[0], ref, atol=1e-3, rtol=1e-4), "mismatch vs reference"

    # Second check: ragged M (M % tm != 0) exercises the masked last block.
    input_ids2 = jax.random.randint(k_ids2, (batch, 5), 0, vocab)
    h2 = base_model_stub(input_ids2, embedding)[0]
    out2 = lora_forward(h2, lora_A, lora_B, alpha=alpha)
    jax.block_until_ready(out2)
    ref2 = h2 + alpha * (h2 @ lora_A @ lora_B)
    assert jnp.allclose(out2, ref2, atol=1e-3, rtol=1e-4), "mismatch vs reference (ragged M)"

    print("KERNEL_OK")
</pallas_src>

<mosaic_0001>
module attributes {stable_mosaic.version = 11 : i64} {
  func.func @_lora_kernel(%arg0: i32, %arg1: memref<8x128xf32, #tpu.memory_space<vmem>>, %arg2: memref<128x8xf32, #tpu.memory_space<vmem>>, %arg3: memref<8x128xf32, #tpu.memory_space<vmem>>, %arg4: memref<8x128xf32, #tpu.memory_space<vmem>>) attributes {dimension_semantics = [#tpu.dimension_semantics<parallel>], iteration_bounds = array<i64: 2>, scalar_prefetch = 0 : i64, scratch_operands = 0 : i64, tpu.core_type = #tpu.core_type<tc>, window_params = [{transform_indices = @transform_0, window_bounds = array<i64: 8, 128>}, {pipeline_mode = #tpu.pipeline_mode<synchronous>, transform_indices = @transform_1, window_bounds = array<i64: 128, 8>}, {pipeline_mode = #tpu.pipeline_mode<synchronous>, transform_indices = @transform_2, window_bounds = array<i64: 8, 128>}, {transform_indices = @transform_3, window_bounds = array<i64: 8, 128>}]} {
    %c0 = arith.constant 0 : index
    %c0_0 = arith.constant 0 : index
    %0 = vector.load %arg1[%c0, %c0_0] : memref<8x128xf32, #tpu.memory_space<vmem>>, vector<8x128xf32>
    %c0_1 = arith.constant 0 : index
    %c0_2 = arith.constant 0 : index
    %1 = vector.load %arg2[%c0_1, %c0_2] : memref<128x8xf32, #tpu.memory_space<vmem>>, vector<128x8xf32>
    %cst = arith.constant dense<0.000000e+00> : vector<8x8xf32>
    %2 = tpu.matmul %0, %1, %cst {dimension_numbers = #tpu.dot_dimension_numbers<[1], [0], [0], [1], [0, 0, 1, 1], [], []>} : vector<8x128xf32>, vector<128x8xf32>, vector<8x8xf32> -> vector<8x8xf32>
    %c0_3 = arith.constant 0 : index
    %c0_4 = arith.constant 0 : index
    %3 = vector.load %arg3[%c0_3, %c0_4] : memref<8x128xf32, #tpu.memory_space<vmem>>, vector<8x128xf32>
    %cst_5 = arith.constant dense<0.000000e+00> : vector<8x128xf32>
    %4 = tpu.matmul %2, %3, %cst_5 {dimension_numbers = #tpu.dot_dimension_numbers<[1], [0], [0], [1], [0, 0, 1, 1], [], []>} : vector<8x8xf32>, vector<8x128xf32>, vector<8x128xf32> -> vector<8x128xf32>
    %5 = arith.addf %0, %4 : vector<8x128xf32>
    %c0_6 = arith.constant 0 : index
    %c0_7 = arith.constant 0 : index
    %6 = vector.load %arg4[%c0_6, %c0_7] : memref<8x128xf32, #tpu.memory_space<vmem>>, vector<8x128xf32>
    tpu.vector_store %arg4[%c0_6, %c0_7], %5 {strides = array<i32>} : memref<8x128xf32, #tpu.memory_space<vmem>>, vector<8x128xf32>,
    return
  }
  func.func @transform_0(%arg0: i32) -> (i32, i32) {
    %c0_i32 = arith.constant 0 : i32
    %c0_i32_0 = arith.constant 0 : i32
    return %arg0, %c0_i32 : i32, i32
  }
  func.func @transform_1(%arg0: i32) -> (i32, i32) {
    %c0_i32 = arith.constant 0 : i32
    %c0_i32_0 = arith.constant 0 : i32
    %c0_i32_1 = arith.constant 0 : i32
    return %c0_i32, %c0_i32_0 : i32, i32
  }
  func.func @transform_2(%arg0: i32) -> (i32, i32) {
    %c0_i32 = arith.constant 0 : i32
    %c0_i32_0 = arith.constant 0 : i32
    %c0_i32_1 = arith.constant 0 : i32
    return %c0_i32, %c0_i32_0 : i32, i32
  }
  func.func @transform_3(%arg0: i32) -> (i32, i32) {
    %c0_i32 = arith.constant 0 : i32
    %c0_i32_0 = arith.constant 0 : i32
    return %arg0, %c0_i32 : i32, i32
  }
}

</mosaic_0001>

<bundles_post_ra>
// kernel: tpu_custom_call.1
= control target key start
LH: loop header
LB: loop body
LE: loop exit
PB: predicated region body
PF: predicated region fallthrough
CT: control target
= control target key end

     0   :  { %8 = vsyncpa [#allocation3], 0  ;;  %s743_s0 = inlined_call_operand.vmem [shape: f32[16,128], index: 0, kind: input, shape index: {}]   ;;  %s744_s1 = inlined_call_operand.vmem [shape: f32[128,8], index: 1, kind: input, shape index: {}]   ;;  %s745_s2 = inlined_call_operand.vmem [shape: f32[8,128], index: 2, kind: input, shape index: {}]   ;;  %s746_s3 = inlined_call_operand.hbm [shape: f32[16,128], index: 3, kind: output, shape index: {}]  }
   0x1   :  { %10 = vsyncpa [#allocation3 + $0x1], 0  ;;  %s599_s12 = smov 0   ;;  %s601_s13 = smov 0  }
   0x2   :  { %s603_s14 = smov 0   ;;  %s605_s15 = smov 0  }
   0x3 LB: > { %s620_s16 = sadd.s32 4294967295, %s574_s15   ;;  %s403_s17 = sadd.s32 4294967294, %s574_s15   ;;  %s574_s15 = sphi %s605_s15, %s752_s15   ;;  %s570_s14 = sphi %s603_s14, %s751_s14   ;;  %s566_s13 = sphi %s601_s13, %s750_s13   ;;  %s562_s12 = sphi %s599_s12, %s749_s12  }
   0x4   : > { %s624_s18 = sadd.s32 1, %s574_s15   ;;  %s91_s19 = sadd.s32 1, %s570_s14 }
   0x5   : > { %s88_s20 = ssub.s32 %s574_s15, %s624_s18  ;;  %p101_p0 = scmp.ne.s32.totalorder %s570_s14, %s566_s13 }
   0x6   : > { %p89_p1 = scmp.eq.s32.totalorder %s88_s20, 0  ;;  %p102_p2 = scmp.eq.s32.totalorder %s620_s16, 1 }
   0x7   : > { %p107_p3 = scmp.ne.s32.totalorder %s566_s13, %s562_s12  ;;  %p108_p4 = scmp.eq.s32.totalorder %s403_s17, 1 }
   0x8   : > { %s635_s21 = scalar_select %p89_p1, %s570_s14, %s91_s19  }
   0x9   : > { %p637_p5 = por %p102_p2, %p101_p0  ;;  %p641_p6 = por %p108_p4, %p107_p3 }
   0xa   : > { %p406_p7 = scmp.ge.s32.totalorder %s574_s15, 1  ;;  %p139_p8 = scmp.lt.s32.totalorder %s574_s15, 3 }
   0xc   : > { %p140_p9 = pnand %p406_p7, %p139_p8 }
   0xd   : > { %p162_p10 = scmp.lt.s32.totalorder (!%p140_p9), %s620_s16, 1  ;;  %s159_s27 = sand.u32 (!%p140_p9), 1, %s566_s13  }
   0xe   : > { %143 = sbr.rel (%p140_p9) target bundleno = 453 (0x1c5), region = 32  ;;  %s411_s29 = sshll.u32 (!%p140_p9), %s620_s16, 7 }
   0xf   : > { %s708_s7 = scalar_lea.hbm (!%p140_p9), %s746_s3, %s411_s29  ;;  %s331_s8 = scalar_lea.sflag (!%p140_p9), [#allocation3], %s159_s27 }
  0x10   : > { %s578_s10 = smov (!%p140_p9), [#allocation2]  }
  0x13   : > { %v182_v0 = vld [vmem:[%s744_s1 + $0x78] sm:$0xff]  ;;  %v576_v1 = vmov 0.0   ;;  %v181_v2 = vld [vmem:[%s744_s1 + $0x70] sm:$0xff]  ;;  %vm577_vm0 = vmmov 0   ;;  %v180_v3 = vld [vmem:[%s744_s1 + $0x68] sm:$0xff]  ;;  %s163_s28 = scalar_select %p162_p10, %s620_s16, 1 }
  0x14   : > { %433 = vmatprep.subr.mxu0 %v576_v1  ;;  %465 = vmatprep.mubr.msk.f32.mxu0 %vm577_vm0, %v576_v1  ;;  %v179_v4 = vld [vmem:[%s744_s1 + $0x60] sm:$0xff]  ;;  %v178_v5 = vld [vmem:[%s744_s1 + $0x58] sm:$0xff]  ;;  %v177_v6 = vld [vmem:[%s744_s1 + $0x50] sm:$0xff]  ;;  %vm254_vm1 = vcmask 64512   ;;  %s518_s16 = sshll.u32 %s578_s10, 4  ;;  %s519_s16 = int_to_ptr.vmem [resolvable:$false] %s518_s16 }
  0x15   : > { %434 = vmatpush3.msra.mxu0 %v182_v0  ;;  %468 = vmatprep.subr.mxu1 %v576_v1  ;;  %v176_v7 = vld [vmem:[%s744_s1 + $0x48] sm:$0xff]  ;;  %v175_v8 = vld [vmem:[%s744_s1 + $0x40] sm:$0xff]  ;;  %v174_v9 = vld [vmem:[%s744_s1 + $0x38] sm:$0xff]  ;;  %s408_s6 = sshll.u32 %s163_s28, 3  ;;  %s407_s28 = sshll.u32 %s159_s27, 3 }
  0x16   : > { %435 = vmatprep.subr.mxu0 %v576_v1  ;;  %470 = vmatprep.mubr.msk.f32.mxu1 %vm577_vm0, %v576_v1  ;;  %v173_v10 = vld [vmem:[%s744_s1 + $0x30] sm:$0xff]  ;;  %v172_v11 = vld [vmem:[%s744_s1 + $0x28] sm:$0xff]  ;;  %v171_v12 = vld [vmem:[%s744_s1 + $0x20] sm:$0xff]  ;;  %s165_s19 = scalar_lea.vmem %s743_s0, %s408_s6  ;;  %s161_s30 = scalar_lea.vmem [#allocation2], %s407_s28 }
  0x17   : > { %436 = vmatpush3.msra.mxu0 %v181_v2  ;;  %v170_v13 = vld [vmem:[%s744_s1 + $0x18] sm:$0xff]  ;;  %v169_v14 = vld [vmem:[%s744_s1 + $0x10] sm:$0xff]  ;;  %v168_v15 = vld [vmem:[%s744_s1 + $0x8] sm:$0xff]  ;;  %s344_s4 = sshll.u32 %s161_s30, 4  ;;  %s520_s11 = scalar_lea.vmem %s519_s16, 256  ;;  %s345_s4 = int_to_ptr.vmem [resolvable:$true] %s344_s4 }
  0x18   : > { %437 = vmatprep.subr.mxu0 %v576_v1  ;;  %v167_v16 = vld [vmem:[%s744_s1] sm:$0xff]  ;;  %s514_s9 = scalar_lea.vmem %s345_s4, 128  ;;  %p521_p0 = scmp.lt.s32.totalorder %s345_s4, %s519_s16 }
  0x19   : > { %438 = vmatpush3.msra.mxu0 %v180_v3  ;;  %v166_v17 = vld [vmem:[%s165_s19] sm:$0xff]  ;;  %p515_p11 = scmp.ne.s32.totalorder %s345_s4, %s514_s9  ;;  %p522_p1 = scmp.lt.s32.totalorder %s520_s11, %s514_s9 }
  0x1a   : > { %439 = vmatprep.subr.mxu0 %v576_v1  ;;  %v253_v18 = vld [vmem:[%s745_s2] sm:$0xff] }
  0x1b   : > { %440 = vmatpush3.msra.mxu0 %v179_v4  ;;  %469 = vmatpush3.msra.mxu1 %v253_v18  ;;  %p516_p12 = pnand %p515_p11, %p637_p5  ;;  %p523_p2 = por %p522_p1, %p521_p0 }
  0x1c   : > { %441 = vmatprep.subr.mxu0 %v576_v1 }
  0x1d   : > { %442 = vmatpush3.msra.mxu0 %v178_v5  ;;  %p517_p13 = pneg %p516_p12 }
  0x1e   : > { %443 = vmatprep.subr.mxu0 %v576_v1 }
  0x1f   : > { %444 = vmatpush3.msra.mxu0 %v177_v6  ;;  %p524_p3 = pnand %p523_p2, %p517_p13 }
  0x20   : > { %445 = vmatprep.subr.mxu0 %v576_v1 }
  0x21   : > { %446 = vmatpush3.msra.mxu0 %v176_v7 }
  0x22   : > { %447 = vmatprep.subr.mxu0 %v576_v1 }
  0x23   : > { %448 = vmatpush3.msra.mxu0 %v175_v8 }
  0x24   : > { %449 = vmatprep.subr.mxu0 %v576_v1 }
  0x25   : > { %450 = vmatpush3.msra.mxu0 %v174_v9 }
  0x26   : > { %451 = vmatprep.subr.mxu0 %v576_v1 }
  0x27   : > { %452 = vmatpush3.msra.mxu0 %v173_v10 }
  0x28   : > { %453 = vmatprep.subr.mxu0 %v576_v1 }
  0x29   : > { %454 = vmatpush3.msra.mxu0 %v172_v11 }
  0x2a   : > { %455 = vmatprep.subr.mxu0 %v576_v1 }
  0x2b   : > { %456 = vmatpush3.msra.mxu0 %v171_v12 }
  0x2c   : > { %457 = vmatprep.subr.mxu0 %v576_v1 }
  0x2d   : > { %458 = vmatpush3.msra.mxu0 %v170_v13 }
  0x2e   : > { %459 = vmatprep.subr.mxu0 %v576_v1 }
  0x2f   : > { %460 = vmatpush3.msra.mxu0 %v169_v14 }
  0x30   : > { %461 = vmatprep.subr.mxu0 %v576_v1 }
  0x31   : > { %462 = vmatpush3.msra.mxu0 %v168_v15 }
  0x32   : > { %463 = vmatprep.subr.mxu0 %v576_v1 }
  0x33   : > { %464 = vmatpush3.msra.mxu0 %v167_v16 }
  0x34   : > { %466 = vmatmul.mubr.f32.vlgmr.msra.gmra.mxu0 %v166_v17 }
  0xf4   : > { %v249_v19 = vpop.f32.mrf.mxu0 }
  0xf5   : > { %471 = vmatmul.mubr.msk.f32.vlgmr.msra.gmra.mxu1 %vm254_vm1, %v249_v19 }
  0xf6   : > { %v467_v20 = vpop.f32.mrf.mxu0 }
 0x1b5   : > { %v324_v21 = vpop.f32.mrf.mxu1 }
 0x1b6   : > { %v328_v22 = vadd.f32 %v324_v21, %v166_v17 }
 0x1b7   : > { %v472_v23 = vpop.f32.mrf.mxu1 }
 0x1b8   : > { %329 = vst [vmem:[%s161_s30] sm:$0xff] %v328_v22 }
 0x1b9   : > { %527 = shalt.err (!%p524_p3)
}
 0x1ba   : > { %s528_s17 = scalar_lea.hbm %s708_s7, 128  ;;  %s532_s24 = scalar_lea.hbm %s746_s3, 256 }
 0x1bb   : > { %p529_p4 = scmp.ne.s32.totalorder %s708_s7, %s528_s17  ;;  %p533_p9 = scmp.lt.s32.totalorder %s708_s7, %s746_s3 }
 0x1bc   : > { %p534_p10 = scmp.lt.s32.totalorder %s532_s24, %s528_s17 }
 0x1bd   : > { %p530_p7 = pnand %p529_p4, %p637_p5 }
 0x1be   : > { %p535_p11 = por %p534_p10, %p533_p9 }
 0x1bf   : > { %p531_p8 = pneg %p530_p7 }
 0x1c1   : > { %p536_p12 = pnand %p535_p11, %p531_p8 }
 0x1c3   : > { %539 = shalt.err (!%p536_p12)
}
 0x1c4   : > { %473 = dma.vmem_to_hbm [thread:$0]  (%p637_p5), %s345_s4, 128, %s708_s7, %s331_s8  }
 0x1c5 PF: > { %p479_p13 = scmp.ge.s32.totalorder %s574_s15, 2  ;;  %s356_s27 = sand.u32 1, %s562_s12  }
 0x1c6   : > { %s357_s28 = scalar_lea.sflag [#allocation3], %s356_s27 }
 0x1c7   : > { %p476_p0 = pnand %p479_p13, %p641_p6 }
 0x1c9   : > { %p477_p1 = pneg %p476_p0 }
 0x1cb   : > { %557 = dma.done.wait (%p477_p1), %s357_s28, 128  }
 0x1cc   : > { %559 = vsyncadd (%p477_p1), %s357_s28, 4294967168  ;;  %p13_p2 = scmp.ge.s32.totalorder %s624_s18, 4   ;;  %s749_s12 = smov %s566_s13 }
 0x1cd   : > { %s750_s13 = smov %s570_s14  ;;  %s751_s14 = smov %s635_s21 }
 0x1ce   : > { %s752_s15 = smov %s624_s18  ;;  %15 = sbr.rel (!%p13_p2) target bundleno = 3 (0x3), region = 67 }
 0x1d3   :  { %362 = vsyncpa [#allocation3], 1 }
 0x1d4   :  { %364 = vsyncpa [#allocation3 + $0x1], 1 }

</bundles_post_ra>
